<compile_context>
chip_gen: v7x
topology: tpu7x:2x2x1
jax: 0.10.0
libtpu: 0.0.40
codegen_flags: <defaults>
</compile_context>

<pallas_src>
import functools

import jax
import jax.numpy as jnp
from jax import lax
from jax.experimental import pallas as pl
from jax.experimental.pallas import tpu as pltpu

GAMMA = 4.0
ADV_TEMPERATURE = 0.5
AUG_WEIGHT = 2.0
ADVERSARIAL = True
NEG_SHIFT = GAMMA + AUG_WEIGHT      # negative_score = gamma + neg + aug_weight


def _logsigmoid(x):
    # Numerically-stable log(sigmoid(x)) = min(x, 0) - log1p(exp(-|x|))
    return jnp.minimum(x, 0.0) - jnp.log1p(jnp.exp(-jnp.abs(x)))


def _nssal_sub_kernel(pos_ref, neg_ref, out_ref, *, batch, tile_b, n):
    # pos_ref: (1, tile_b)  VMEM, native dtype (lane-dense positive scores)
    # neg_ref: (tile_b, n)  VMEM, native dtype
    # out_ref: (8, 128) f32 VMEM, per-tile partials:
    #          row 0 = sum(logsigmoid(gamma + pos)), row 1 = sum(neg_term)
    i = pl.program_id(0)

    pos = pos_ref[...].astype(jnp.float32)             # cast on the VMEM tile
    neg = neg_ref[...].astype(jnp.float32)

    # ---- positive branch ----------------------------------------------------
    pos_ls = _logsigmoid(GAMMA + pos)                   # (1, tile_b)

    # ---- negative branch (deferred softmax normalization) -------------------
    neg_x = NEG_SHIFT + neg                              # (tile_b, n)
    neg_ls = _logsigmoid(-neg_x)                         # (tile_b, n)
    if ADVERSARIAL:
        z = neg_x * ADV_TEMPERATURE
        z_max = jnp.max(z, axis=-1, keepdims=True)       # XLU row max
        e = jnp.exp(z - z_max)                           # (tile_b, n), <= 1
        # Lane-axis sums on the otherwise-idle MXU (f32 operands, HIGHEST
        # precision to preserve tight tolerance).
        ones_col = jnp.ones((n, 1), jnp.float32)
        num = jnp.dot(e * neg_ls, ones_col,
                      precision=lax.Precision.HIGHEST,
                      preferred_element_type=jnp.float32)     # (tile_b, 1)
        den = jnp.dot(e, ones_col,
                      precision=lax.Precision.HIGHEST,
                      preferred_element_type=jnp.float32)     # (tile_b, 1)
        neg_term = num * pl.reciprocal(den, approx=False)     # (tile_b, 1)
    else:
        neg_term = jnp.mean(neg_ls, axis=-1, keepdims=True)

    # ---- ragged last tile: trailing selects only (NaNs can't reach sums) ----
    if (batch % tile_b) != 0:                            # static at trace time
        row0 = i * tile_b
        row_mask = (lax.broadcasted_iota(jnp.int32, (tile_b, 1), 0) + row0) < batch
        lane_mask = (lax.broadcasted_iota(jnp.int32, (1, tile_b), 1) + row0) < batch
        pos_ls = jnp.where(lane_mask, pos_ls, 0.0)
        neg_term = jnp.where(row_mask, neg_term, 0.0)

    sum_pos = jnp.sum(pos_ls, axis=1, keepdims=True)     # (1, 1)
    sum_neg = jnp.sum(neg_term, axis=0, keepdims=True)   # (1, 1)

    row = lax.broadcasted_iota(jnp.int32, (8, 128), 0)
    out_ref[...] = jnp.where(row == 0, sum_pos,
                             jnp.where(row == 1, sum_neg, 0.0))


def _choose_tile_b(batch, n, target_compute_bytes=4 * 1024 * 1024):
    # Size the (tile_b, n) block so each f32 elementwise temporary is ~4 MiB:
    # inputs (double-buffered, <= 4 MiB f32 / 2 MiB bf16 each) + a handful of
    # f32 temporaries stay well under the 32 MiB scoped VMEM default (safe on
    # v7x's 64 MiB/TC).  tile_b is a multiple of 128 so the lane-dense
    # (1, tile_b) positive block stays aligned; small batches use one tile.
    rows = target_compute_bytes // (max(n, 1) * 4)
    rows = max(128, (rows // 128) * 128)
    if rows >= batch:
        return int(batch)
    return int(rows)


def nssal_sub_loss(positive_samples_score, negative_samples_score, tile_b=None):
    """Pallas forward of NSSAL_sub (subsampling_weight=None, dis_weight=None)."""
    b = positive_samples_score.shape[0]
    n = negative_samples_score.shape[-1]

    # Keep the native dtype in HBM (no wrapper-side f32 upcast); the kernel
    # casts per tile in VMEM.
    pos_t = positive_samples_score.reshape(1, b)          # lane-dense
    neg = negative_samples_score

    if tile_b is None:
        tile_b = _choose_tile_b(b, n)
    num_tiles = pl.cdiv(b, tile_b)

    kernel = functools.partial(_nssal_sub_kernel, batch=b, tile_b=tile_b, n=n)

    partials = pl.pallas_call(
        kernel,
        out_shape=jax.ShapeDtypeStruct((num_tiles * 8, 128), jnp.float32),
        grid=(num_tiles,),
        in_specs=[
            pl.BlockSpec((1, tile_b), lambda i: (0, i)),
            pl.BlockSpec((tile_b, n), lambda i: (i, 0)),
        ],
        out_specs=pl.BlockSpec((8, 128), lambda i: (i, 0)),
        compiler_params=pltpu.CompilerParams(
            dimension_semantics=("parallel",),            # tiles independent
            vmem_limit_bytes=48 * 1024 * 1024,
        ),
    )(pos_t, neg)

    partials = partials.reshape(num_tiles, 8, 128)
    sum_pos = jnp.sum(partials[:, 0, 0])
    sum_neg = jnp.sum(partials[:, 1, 0])
    return (-sum_pos - sum_neg) / (2.0 * b)


def _reference(pos, neg):
    pos = pos.astype(jnp.float32)
    neg = neg.astype(jnp.float32)
    pos_score = jax.nn.log_sigmoid(GAMMA + pos).squeeze(-1)
    neg_x = GAMMA + neg + AUG_WEIGHT
    w = jax.nn.softmax(neg_x * ADV_TEMPERATURE, axis=-1)
    neg_term = (w * jax.nn.log_sigmoid(-neg_x)).sum(axis=1)
    return (-pos_score.mean() - neg_term.mean()) / 2.0


if __name__ == "__main__":
    key = jax.random.PRNGKey(0)
    k1, k2, k3, k4, k5, k6 = jax.random.split(key, 6)

    # Case 1: small single-tile path (B=8, N=128), f32.
    pos_a = jax.random.normal(k1, (8, 1), dtype=jnp.float32) * 3.0
    neg_a = jax.random.normal(k2, (8, 128), dtype=jnp.float32) * 3.0
    loss_a = jax.block_until_ready(nssal_sub_loss(pos_a, neg_a))
    ref_a = _reference(pos_a, neg_a)
    assert jnp.allclose(loss_a, ref_a, rtol=1e-5, atol=2e-5), (loss_a, ref_a)

    # Case 2: multi-tile + ragged last tile (B=300, N=128, tile_b=128 -> 3 tiles).
    pos_b = jax.random.normal(k3, (300, 1), dtype=jnp.float32) * 3.0
    neg_b = jax.random.normal(k4, (300, 128), dtype=jnp.float32) * 3.0
    loss_b = jax.block_until_ready(nssal_sub_loss(pos_b, neg_b, tile_b=128))
    ref_b = _reference(pos_b, neg_b)
    assert jnp.allclose(loss_b, ref_b, rtol=1e-5, atol=2e-5), (loss_b, ref_b)

    # Case 3: native-bf16 inputs stay bf16 in HBM (B=256, N=256, tile_b=128).
    pos_c = (jax.random.normal(k5, (256, 1), dtype=jnp.float32) * 3.0).astype(jnp.bfloat16)
    neg_c = (jax.random.normal(k6, (256, 256), dtype=jnp.float32) * 3.0).astype(jnp.bfloat16)
    loss_c = jax.block_until_ready(nssal_sub_loss(pos_c, neg_c, tile_b=128))
    ref_c = _reference(pos_c, neg_c)
    assert jnp.allclose(loss_c, ref_c, rtol=1e-4, atol=1e-4), (loss_c, ref_c)

    print("KERNEL_OK")
</pallas_src>

<mosaic_0001>
module attributes {stable_mosaic.version = 11 : i64} {
  func.func @_nssal_sub_kernel(%arg0: i32, %arg1: memref<1x8xf32, #tpu.memory_space<vmem>>, %arg2: memref<8x128xf32, #tpu.memory_space<vmem>>, %arg3: memref<8x128xf32, #tpu.memory_space<vmem>>) attributes {dimension_semantics = [#tpu.dimension_semantics<parallel>], iteration_bounds = array<i64: 1>, scalar_prefetch = 0 : i64, scratch_operands = 0 : i64, tpu.core_type = #tpu.core_type<tc>, window_params = [{transform_indices = @transform_0, window_bounds = array<i64: 1, 8>}, {transform_indices = @transform_1, window_bounds = array<i64: 8, 128>}, {transform_indices = @transform_2, window_bounds = array<i64: 8, 128>}]} {
    %c0 = arith.constant 0 : index
    %c0_0 = arith.constant 0 : index
    %0 = vector.load %arg1[%c0, %c0_0] : memref<1x8xf32, #tpu.memory_space<vmem>>, vector<1x8xf32>
    %c0_1 = arith.constant 0 : index
    %c0_2 = arith.constant 0 : index
    %1 = vector.load %arg2[%c0_1, %c0_2] : memref<8x128xf32, #tpu.memory_space<vmem>>, vector<8x128xf32>
    %cst = arith.constant 4.000000e+00 : f32
    %2 = vector.broadcast %cst : f32 to vector<1x8xf32>
    %3 = arith.addf %2, %0 : vector<1x8xf32>
    %cst_3 = arith.constant 0.000000e+00 : f32
    %4 = vector.broadcast %cst_3 : f32 to vector<1x8xf32>
    %5 = arith.minimumf %3, %4 : vector<1x8xf32>
    %6 = math.absf %3 : vector<1x8xf32>
    %cst_4 = arith.constant 0.000000e+00 : f32
    %7 = vector.broadcast %cst_4 : f32 to vector<1x8xf32>
    %8 = arith.subf %7, %6 : vector<1x8xf32>
    %9 = math.exp %8 : vector<1x8xf32>
    %10 = math.log1p %9 : vector<1x8xf32>
    %11 = arith.subf %5, %10 : vector<1x8xf32>
    %cst_5 = arith.constant 6.000000e+00 : f32
    %12 = vector.broadcast %cst_5 : f32 to vector<8x128xf32>
    %13 = arith.addf %12, %1 : vector<8x128xf32>
    %cst_6 = arith.constant 0.000000e+00 : f32
    %14 = vector.broadcast %cst_6 : f32 to vector<8x128xf32>
    %15 = arith.subf %14, %13 : vector<8x128xf32>
    %cst_7 = arith.constant 0.000000e+00 : f32
    %16 = vector.broadcast %cst_7 : f32 to vector<8x128xf32>
    %17 = arith.minimumf %15, %16 : vector<8x128xf32>
    %18 = math.absf %15 : vector<8x128xf32>
    %cst_8 = arith.constant 0.000000e+00 : f32
    %19 = vector.broadcast %cst_8 : f32 to vector<8x128xf32>
    %20 = arith.subf %19, %18 : vector<8x128xf32>
    %21 = math.exp %20 : vector<8x128xf32>
    %22 = math.log1p %21 : vector<8x128xf32>
    %23 = arith.subf %17, %22 : vector<8x128xf32>
    %cst_9 = arith.constant 5.000000e-01 : f32
    %24 = vector.broadcast %cst_9 : f32 to vector<8x128xf32>
    %25 = arith.mulf %13, %24 : vector<8x128xf32>
    %cst_10 = arith.constant dense<0xFF800000> : vector<8xf32>
    %26 = vector.multi_reduction <maximumf>, %25, %cst_10 [1] : vector<8x128xf32> to vector<8xf32>
    %27 = vector.shape_cast %26 : vector<8xf32> to vector<8x1xf32>
    %28 = vector.broadcast %27 : vector<8x1xf32> to vector<8x128xf32>
    %29 = arith.subf %25, %28 : vector<8x128xf32>
    %30 = math.exp %29 : vector<8x128xf32>
    %cst_11 = arith.constant 1.000000e+00 : f32
    %31 = vector.broadcast %cst_11 : f32 to vector<128x1xf32>
    %32 = arith.mulf %30, %23 : vector<8x128xf32>
    %cst_12 = arith.constant dense<0.000000e+00> : vector<8x1xf32>
    %33 = tpu.matmul %32, %31, %cst_12 {dimension_numbers = #tpu.dot_dimension_numbers<[1], [0], [0], [1], [0, 0, 1, 1], [], []>, precision = #tpu.contract_precision<fp32>} : vector<8x128xf32>, vector<128x1xf32>, vector<8x1xf32> -> vector<8x1xf32>
    %cst_13 = arith.constant dense<0.000000e+00> : vector<8x1xf32>
    %34 = tpu.matmul %30, %31, %cst_13 {dimension_numbers = #tpu.dot_dimension_numbers<[1], [0], [0], [1], [0, 0, 1, 1], [], []>, precision = #tpu.contract_precision<fp32>} : vector<8x128xf32>, vector<128x1xf32>, vector<8x1xf32> -> vector<8x1xf32>
    %35 = tpu.reciprocal %34 : vector<8x1xf32> -> vector<8x1xf32>
    %36 = arith.mulf %33, %35 : vector<8x1xf32>
    %cst_14 = arith.constant dense<0.000000e+00> : vector<1xf32>
    %37 = vector.multi_reduction <add>, %11, %cst_14 [1] : vector<1x8xf32> to vector<1xf32>
    %38 = vector.shape_cast %37 : vector<1xf32> to vector<1x1xf32>
    %cst_15 = arith.constant dense<0.000000e+00> : vector<1xf32>
    %39 = vector.multi_reduction <add>, %36, %cst_15 [0] : vector<8x1xf32> to vector<1xf32>
    %40 = vector.shape_cast %39 : vector<1xf32> to vector<1x1xf32>
    %41 = tpu.iota {dimensions = array<i32: 0>} : vector<8x128xi32>
    %c0_i32 = arith.constant 0 : i32
    %42 = vector.broadcast %c0_i32 : i32 to vector<8x128xi32>
    %43 = arith.cmpi eq, %41, %42 : vector<8x128xi32>
    %c1_i32 = arith.constant 1 : i32
    %44 = vector.broadcast %c1_i32 : i32 to vector<8x128xi32>
    %45 = arith.cmpi eq, %41, %44 : vector<8x128xi32>
    %cst_16 = arith.constant 0.000000e+00 : f32
    %46 = vector.shape_cast %40 : vector<1x1xf32> to vector<1x1xf32>
    %47 = vector.broadcast %46 : vector<1x1xf32> to vector<8x128xf32>
    %48 = vector.broadcast %cst_16 : f32 to vector<8x128xf32>
    %49 = arith.select %45, %47, %48 : vector<8x128xi1>, vector<8x128xf32>
    %50 = vector.shape_cast %38 : vector<1x1xf32> to vector<1x1xf32>
    %51 = vector.broadcast %50 : vector<1x1xf32> to vector<8x128xf32>
    %52 = arith.select %43, %51, %49 : vector<8x128xi1>, vector<8x128xf32>
    %c0_17 = arith.constant 0 : index
    %c0_18 = arith.constant 0 : index
    %53 = vector.load %arg3[%c0_17, %c0_18] : memref<8x128xf32, #tpu.memory_space<vmem>>, vector<8x128xf32>
    tpu.vector_store %arg3[%c0_17, %c0_18], %52 {strides = array<i32>} : memref<8x128xf32, #tpu.memory_space<vmem>>, vector<8x128xf32>,
    return
  }
  func.func @transform_0(%arg0: i32) -> (i32, i32) {
    %c0_i32 = arith.constant 0 : i32
    %c0_i32_0 = arith.constant 0 : i32
    return %c0_i32, %arg0 : i32, i32
  }
  func.func @transform_1(%arg0: i32) -> (i32, i32) {
    %c0_i32 = arith.constant 0 : i32
    %c0_i32_0 = arith.constant 0 : i32
    return %arg0, %c0_i32 : i32, i32
  }
  func.func @transform_2(%arg0: i32) -> (i32, i32) {
    %c0_i32 = arith.constant 0 : i32
    %c0_i32_0 = arith.constant 0 : i32
    return %arg0, %c0_i32 : i32, i32
  }
}

</mosaic_0001>

<bundles_post_ra>
// kernel: tpu_custom_call.1
= control target key start
LH: loop header
LB: loop body
LE: loop exit
PB: predicated region body
PF: predicated region fallthrough
CT: control target
= control target key end

     0   :  { %7 = vsyncpa [#allocation3], 0  ;;  %s1757_s0 = inlined_call_operand.hbm [shape: f32[1,8], index: 0, kind: input, shape index: {}]   ;;  %s1758_s1 = inlined_call_operand.hbm [shape: f32[8,128], index: 1, kind: input, shape index: {}]   ;;  %s1759_s2 = inlined_call_operand.hbm [shape: f32[8,128], index: 2, kind: output, shape index: {}]  }
   0x1   :  { %8 = vsyncpa [#allocation6], 0 }
   0x2   :  { %9 = vsyncpa [#allocation4], 0  ;;  %s1554_s9 = smov [#allocation2]   ;;  %s1555_s11 = smov [#allocation5]  }
   0x3   :  { %s16_s10 = sshll.u32 %s1554_s9, 4  ;;  %s26_s12 = sshll.u32 %s1555_s11, 4  ;;  %s17_s10 = int_to_ptr.vmem [resolvable:$true] %s16_s10  ;;  %s27_s12 = int_to_ptr.vmem [resolvable:$true] %s26_s12 }
   0x4   :  { %s1482_s15 = scalar_lea.hbm %s1757_s0, 16 }
   0x5   :  { %p1483_p0 = scmp.ne.s32.totalorder %s1757_s0, %s1482_s15  ;;  %p1486_p1 = scmp.lt.u32.totalorder %s1482_s15, %s1757_s0 }
   0x7   :  { %p1488_p2 = pnand %p1486_p1, %p1483_p0 }
   0x9   :  { %1491 = shalt.err (!%p1488_p2)
}
   0xa   :  { %s1492_s20 = scalar_lea.vmem %s17_s10, 16  ;;  %s1496_s21 = scalar_lea.vmem %s17_s10, 32 }
   0xb   :  { %p1493_p3 = scmp.ne.s32.totalorder %s17_s10, %s1492_s20  ;;  %p1497_p4 = scmp.lt.s32.totalorder %s17_s10, %s17_s10 }
   0xc   :  { %p1498_p5 = scmp.lt.s32.totalorder %s1496_s21, %s1492_s20 }
   0xe   :  { %p1499_p6 = por %p1498_p5, %p1497_p4 }
  0x10   :  { %p1500_p7 = pnand %p1499_p6, %p1493_p3 }
  0x12   :  { %1503 = shalt.err (!%p1500_p7)
}
  0x13   :  { %19 = dma.hbm_to_vmem [thread:$0]  %s1757_s0, 16, %s17_s10, [#allocation3]  }
  0x14   :  { %s1504_s26 = scalar_lea.hbm %s1758_s1, 128 }
  0x15   :  { %p1505_p8 = scmp.ne.s32.totalorder %s1758_s1, %s1504_s26  ;;  %p1508_p9 = scmp.lt.u32.totalorder %s1504_s26, %s1758_s1 }
  0x17   :  { %p1510_p10 = pnand %p1508_p9, %p1505_p8 }
  0x19   :  { %1513 = shalt.err (!%p1510_p10)
}
  0x1a   :  { %s1514_s3 = scalar_lea.vmem %s27_s12, 128  ;;  %p1519_p12 = scmp.lt.s32.totalorder %s27_s12, %s27_s12 }
  0x1b   :  { %p1515_p11 = scmp.ne.s32.totalorder %s27_s12, %s1514_s3  ;;  %p1520_p13 = scmp.lt.s32.totalorder %s1514_s3, %s1514_s3 }
  0x1d   :  { %p1521_p0 = por %p1520_p13, %p1519_p12 }
  0x1f   :  { %p1522_p1 = pnand %p1521_p0, %p1515_p11 }
  0x21   :  { %1525 = shalt.err (!%p1522_p1)
}
  0x22   :  { %29 = dma.hbm_to_vmem [thread:$0]  %s1758_s1, 128, %s27_s12, [#allocation6]  }
  0x23   :  { %1548 = dma.done.wait [#allocation3], 16  }
  0x24   :  { %1549 = vsyncadd [#allocation3], 4294967280 }
  0x25   :  { %1550 = dma.done.wait [#allocation6], 128  }
  0x26   :  { %1551 = vsyncadd [#allocation6], 4294967168  ;;  %v1556_v0 = vmov 0.0|0.0   ;;  %v1557_v1 = vmov 1.0|1.0   ;;  %v37_v2 = vld [vmem:[#allocation5] sm:$0xff] }
  0x27   :  { %1392 = vmatprep.subr.bf16.mxu1 %v1556_v0  ;;  %1344 = vmatprep.subr.bf16.mxu0 %v1556_v0  ;;  %v54_v3 = vadd.f32 6.0, %v37_v2  ;;  %vm1558_vm0 = vmmov 0   ;;  %v1559_v5 = vmov 0.0   ;;  %v36_v36 = vld [vmem:[#allocation2] sm:$0x1]  ;;  %vm946_vm3 = vcmask 57344  }
  0x28   :  { %1393 = vmatpush3.bf16.msra.mxu1 %v1557_v1  ;;  %1345 = vmatpush3.bf16.msra.mxu0 %v1557_v1  ;;  %v38_v37 = vadd.f32 4.0, %v36_v36  ;;  %v1560_v53 = vmov 0   ;;  %vm950_vm4 = vcmask 7168   ;;  %s1561_s1 = smov [#allocation7]  }
  0x29   :  { %1394 = vmatprep.subr.bf16.mxu1 %v1556_v0  ;;  %1346 = vmatprep.subr.bf16.mxu0 %v1556_v0  ;;  %v71_v4 = vmul.f32 0.5, %v54_v3  ;;  %v55_v6 = vsub.f32 0.0, %v54_v3  ;;  %v958_v3 = vlaneseq  ;;  %s980_s5 = sshll.u32 %s1561_s1, 4  ;;  %s981_s5 = int_to_ptr.vmem [resolvable:$true] %s980_s5 }
  0x2a   :  { %1256 = vmatprep.mubr.msk.f32.mxu1 %vm1558_vm0, %v1559_v5  ;;  %1136 = vmatprep.mubr.msk.f32.mxu0 %vm1558_vm0, %v1559_v5  ;;  %v40_v38 = vand.u32 2147483647, %v38_v37  ;;  %v39_v49 = vmin.f32 %v38_v37, 0.0  ;;  %s1526_s6 = scalar_lea.vmem %s981_s5, 128  ;;  %p1531_p3 = scmp.lt.s32.totalorder %s981_s5, %s981_s5 }
  0x2b   :  { %72 = vmax.xlane.f32.xlu0 %v71_v4  ;;  %v57_v7 = vand.u32 2147483647, %v55_v6  ;;  %v56_v21 = vmin.f32 %v55_v6, 0.0  ;;  %1468 = vset.pattern.permute.xlu1 %v1560_v53  ;;  %p1527_p2 = scmp.ne.s32.totalorder %s981_s5, %s1526_s6  ;;  %p1532_p4 = scmp.lt.s32.totalorder %s1526_s6, %s1526_s6 }
  0x2c   :  { %1395 = vmatpush3.bf16.msra.mxu1 %v1557_v1  ;;  %1347 = vmatpush3.bf16.msra.mxu0 %v1557_v1  ;;  %v41_v39 = vsub.f32 0.0, %v40_v38 }
  0x2d   :  { %1396 = vmatprep.subr.bf16.mxu1 %v1556_v0  ;;  %1348 = vmatprep.subr.bf16.mxu0 %v1556_v0  ;;  %v58_v8 = vsub.f32 0.0, %v57_v7  ;;  %p1533_p5 = por %p1532_p4, %p1531_p3 }
  0x2e   :  { %v42_v40 = vmul.f32 1.442695, %v41_v39  ;;  %1469 = vset.pattern.permute.xlu0 %v1560_v53 }
  0x2f   :  { %v59_v9 = vmul.f32 1.442695, %v58_v8  ;;  %p1534_p6 = pnand %p1533_p5, %p1527_p2 }
  0x30   :  { %1397 = vmatpush3.bf16.msra.mxu1 %v1557_v1  ;;  %1349 = vmatpush3.bf16.msra.mxu0 %v1557_v1 }
  0x31   :  { %1398 = vmatprep.subr.bf16.mxu1 %v1556_v0  ;;  %1350 = vmatprep.subr.bf16.mxu0 %v1556_v0  ;;  %1470 = vpow2.f32 %v59_v9 }
  0x34   :  { %1399 = vmatpush3.bf16.msra.mxu1 %v1557_v1  ;;  %1351 = vmatpush3.bf16.msra.mxu0 %v1557_v1 }
  0x35   :  { %1400 = vmatprep.subr.bf16.mxu1 %v1556_v0  ;;  %1352 = vmatprep.subr.bf16.mxu0 %v1556_v0 }
  0x38   :  { %1401 = vmatpush3.bf16.msra.mxu1 %v1557_v1  ;;  %1353 = vmatpush3.bf16.msra.mxu0 %v1557_v1 }
  0x39   :  { %1402 = vmatprep.subr.bf16.mxu1 %v1556_v0  ;;  %1354 = vmatprep.subr.bf16.mxu0 %v1556_v0 }
  0x3b   :  { %v1471_v10 = vpop.eup %1470 }
  0x3c   :  { %1403 = vmatpush3.bf16.msra.mxu1 %v1557_v1  ;;  %1355 = vmatpush3.bf16.msra.mxu0 %v1557_v1  ;;  %v61_v11 = vadd.f32 1.0, %v1471_v10  ;;  %v64_v12 = vmul.f32 -0.5, %v1471_v10  ;;  %v67_v17 = vand.u32 2147483647, %v1471_v10 }
  0x3d   :  { %1404 = vmatprep.subr.bf16.mxu1 %v1556_v0  ;;  %1356 = vmatprep.subr.bf16.mxu0 %v1556_v0 }
  0x3e   :  { %1472 = vlog2.f32 %v61_v11  ;;  %v65_v14 = vadd.f32 1.0, %v64_v12  ;;  %vm68_vm1 = vcmp.lt.f32.partialorder %v67_v17, 0.0004427343 }
  0x40   :  { %1405 = vmatpush3.bf16.msra.mxu1 %v1557_v1  ;;  %1357 = vmatpush3.bf16.msra.mxu0 %v1557_v1  ;;  %v66_v20 = vmul.f32 %v1471_v10, %v65_v14 }
  0x41   :  { %1406 = vmatprep.subr.bf16.mxu1 %v1556_v0  ;;  %1358 = vmatprep.subr.bf16.mxu0 %v1556_v0 }
  0x44   :  { %1407 = vmatpush3.bf16.msra.mxu1 %v1557_v1  ;;  %1359 = vmatpush3.bf16.msra.mxu0 %v1557_v1 }
  0x45   :  { %1259 = vmatprep.subr.mxu1 %v1559_v5  ;;  %1139 = vmatprep.subr.mxu0 %v1559_v5 }
  0x48   :  { %v1473_v16 = vpop.eup %1472 }
  0x49   :  { %v63_v19 = vmul.f32 0.6931472, %v1473_v16 }
  0x4b   :  { %v69_v22 = vsel %vm68_vm1, %v66_v20, %v63_v19 }
  0x4c   :  { %v70_v23 = vsub.f32 %v56_v21, %v69_v22 }
  0xb8   :  { %v73_v13 = vpop.xlane.xlu0 %72 }
  0xb9   :  { %v74_v15 = vsub.f32 %v71_v4, %v73_v13  ;;  %v959_v4 = vshrl.u32 %v958_v3, 7 }
  0xbb   :  { %v75_v18 = vmul.f32 1.442695, %v74_v15  ;;  %vm961_vm5 = vcmp.eq.s32.totalorder %v959_v4, 1  ;;  %vm960_vm6 = vcmp.eq.s32.totalorder %v959_v4, 0 }
  0xbd   :  { %1474 = vpow2.f32 %v75_v18 }
  0xbe   :  { %1476 = vpow2.f32 %v42_v40 }
  0xc7   :  { %v1475_v24 = vpop.eup %1474 }
  0xc8   :  { %v1639_v25 = vand.u32 4294901760, %v1475_v24  ;;  %v77_v26 = vmul.f32 %v1475_v24, %v70_v23  ;;  %v1477_v41 = vpop.eup %1476 }
  0xc9   :  { %v44_v42 = vadd.f32 1.0, %v1477_v41  ;;  %v47_v43 = vmul.f32 -0.5, %v1477_v41  ;;  %v50_v46 = vand.u32 2147483647, %v1477_v41 }
  0xca   :  { %v577_v27 = vsub.f32 %v1475_v24, %v1639_v25  ;;  %v1642_v28 = vand.u32 4294901760, %v77_v26 }
  0xcb   :  { %1478 = vlog2.f32 %v44_v42  ;;  %v48_v44 = vadd.f32 1.0, %v47_v43  ;;  %vm51_vm2 = vcmp.lt.f32.partialorder %v50_v46, 0.0004427343 }
  0xcc   :  { %v578_v29 = vand.u32 4294901760, %v577_v27  ;;  %v144_v30 = vsub.f32 %v77_v26, %v1642_v28 }
  0xcd   :  { %v49_v48 = vmul.f32 %v1477_v41, %v48_v44 }
  0xce   :  { %v579_v31 = vsub.f32 %v577_v27, %v578_v29  ;;  %v145_v32 = vand.u32 4294901760, %v144_v30 }
  0xd0   :  { %v580_v33 = vand.u32 4294901760, %v579_v31  ;;  %v146_v34 = vsub.f32 %v144_v30, %v145_v32 }
  0xd2   :  { %1257 = vmatmul.mubr.f32.vlgmr.msra.gmra.mrb[0].mxu1 %v580_v33  ;;  %v147_v35 = vand.u32 4294901760, %v146_v34 }
  0xd3   :  { %1260 = vmatpush3.msra.mxu1 %v1559_v5  ;;  %1261 = vmatprep.mubr.msk.f32.mxu1 %vm1558_vm0, %v1559_v5 }
  0xd4   :  { %1137 = vmatmul.mubr.f32.vlgmr.msra.gmra.mrb[0].mxu0 %v147_v35  ;;  %1264 = vmatprep.subr.mxu1 %v1559_v5 }
  0xd5   :  { %1140 = vmatpush3.msra.mxu0 %v1559_v5  ;;  %1141 = vmatprep.mubr.msk.f32.mxu0 %vm1558_vm0, %v1559_v5  ;;  %v1479_v45 = vpop.eup %1478 }
  0xd6   :  { %1144 = vmatprep.subr.mxu0 %v1559_v5  ;;  %v46_v47 = vmul.f32 0.6931472, %v1479_v45 }
  0xd8   :  { %v52_v50 = vsel %vm51_vm2, %v49_v48, %v46_v47 }
  0xd9   :  { %v53_v51 = vsub.f32 %v39_v49, %v52_v50 }
  0xda   :  { %1262 = vmatmul.mubr.f32.vlgmr.msra.gmra.mrb[0].mxu1 %v1639_v25 }
  0xdb   :  { %1265 = vmatpush3.msra.mxu1 %v1559_v5  ;;  %1266 = vmatprep.mubr.msk.f32.mxu1 %vm1558_vm0, %v1559_v5  ;;  %v947_v52 = vsel %vm946_vm3, %v53_v51, 0.0 }
  0xdc   :  { %1142 = vmatmul.mubr.f32.vlgmr.msra.gmra.mrb[0].mxu0 %v1642_v28  ;;  %1408 = vmatprep.subr.bf16.mxu1 %v1556_v0 }
  0xdd   :  { %1145 = vmatpush3.msra.mxu0 %v1559_v5  ;;  %1146 = vmatprep.mubr.msk.f32.mxu0 %vm1558_vm0, %v1559_v5 }
  0xde   :  { %1360 = vmatprep.subr.bf16.mxu0 %v1556_v0  ;;  %948 = vadd.xlane.f32.xlu0 %v947_v52 }
  0xe2   :  { %1267 = vmatmul.mubr.f32.vlgmr.msra.gmra.mrb[0].mxu1 %v577_v27 }
  0xe3   :  { %1409 = vmatpush3.bf16.msra.mxu1 %v1557_v1  ;;  %1301 = vmatprep.mubr.msk.f32.mxu1 %vm1558_vm0, %v1559_v5 }
  0xe4   :  { %1147 = vmatmul.mubr.f32.vlgmr.msra.gmra.mrb[0].mxu0 %v144_v30  ;;  %1410 = vmatprep.subr.bf16.mxu1 %v1556_v0 }
  0xe5   :  { %1361 = vmatpush3.bf16.msra.mxu0 %v1557_v1  ;;  %1181 = vmatprep.mubr.msk.f32.mxu0 %vm1558_vm0, %v1559_v5 }
  0xe6   :  { %1362 = vmatprep.subr.bf16.mxu0 %v1556_v0 }
  0xe7   :  { %1411 = vmatpush3.bf16.msra.mxu1 %v1557_v1 }
  0xe8   :  { %1412 = vmatprep.subr.bf16.mxu1 %v1556_v0 }
  0xe9   :  { %1363 = vmatpush3.bf16.msra.mxu0 %v1557_v1 }
  0xea   :  { %1364 = vmatprep.subr.bf16.mxu0 %v1556_v0 }
  0xeb   :  { %1413 = vmatpush3.bf16.msra.mxu1 %v1557_v1 }
  0xec   :  { %1414 = vmatprep.subr.bf16.mxu1 %v1556_v0 }
  0xed   :  { %1365 = vmatpush3.bf16.msra.mxu0 %v1557_v1 }
  0xee   :  { %1366 = vmatprep.subr.bf16.mxu0 %v1556_v0 }
  0xef   :  { %1415 = vmatpush3.bf16.msra.mxu1 %v1557_v1 }
  0xf0   :  { %1416 = vmatprep.subr.bf16.mxu1 %v1556_v0 }
  0xf1   :  { %1367 = vmatpush3.bf16.msra.mxu0 %v1557_v1 }
  0xf2   :  { %1368 = vmatprep.subr.bf16.mxu0 %v1556_v0 }
  0xf3   :  { %1417 = vmatpush3.bf16.msra.mxu1 %v1557_v1 }
  0xf4   :  { %1418 = vmatprep.subr.bf16.mxu1 %v1556_v0 }
  0xf5   :  { %1369 = vmatpush3.bf16.msra.mxu0 %v1557_v1 }
  0xf6   :  { %1370 = vmatprep.subr.bf16.mxu0 %v1556_v0 }
  0xf7   :  { %1419 = vmatpush3.bf16.msra.mxu1 %v1557_v1 }
  0xf8   :  { %1420 = vmatprep.subr.bf16.mxu1 %v1556_v0 }
  0xf9   :  { %1371 = vmatpush3.bf16.msra.mxu0 %v1557_v1 }
  0xfa   :  { %1372 = vmatprep.subr.bf16.mxu0 %v1556_v0 }
  0xfb   :  { %1421 = vmatpush3.bf16.msra.mxu1 %v1557_v1 }
  0xfc   :  { %1422 = vmatprep.subr.bf16.mxu1 %v1556_v0 }
  0xfd   :  { %1373 = vmatpush3.bf16.msra.mxu0 %v1557_v1 }
  0xfe   :  { %1374 = vmatprep.subr.bf16.mxu0 %v1556_v0 }
  0xff   :  { %1423 = vmatpush3.bf16.msra.mxu1 %v1557_v1 }
 0x100   :  { %1304 = vmatprep.subr.mxu1 %v1559_v5 }
 0x101   :  { %1375 = vmatpush3.bf16.msra.mxu0 %v1557_v1 }
 0x102   :  { %1302 = vmatmul.mubr.f32.vlgmr.msra.gmra.mrb[0].mxu1 %v578_v29  ;;  %1184 = vmatprep.subr.mxu0 %v1559_v5 }
 0x103   :  { %1305 = vmatpush3.msra.mxu1 %v1559_v5  ;;  %1306 = vmatprep.mubr.msk.f32.mxu1 %vm1558_vm0, %v1559_v5 }
 0x104   :  { %1182 = vmatmul.mubr.f32.vlgmr.msra.gmra.mrb[0].mxu0 %v145_v32  ;;  %1424 = vmatprep.subr.bf16.mxu1 %v1556_v0 }
 0x105   :  { %1185 = vmatpush3.msra.mxu0 %v1559_v5  ;;  %1186 = vmatprep.mubr.msk.f32.mxu0 %vm1558_vm0, %v1559_v5 }
 0x106   :  { %1376 = vmatprep.subr.bf16.mxu0 %v1556_v0 }
 0x10a   :  { %1307 = vmatmul.mubr.f32.vlgmr.msra.gmra.mrb[0].mxu1 %v1639_v25 }
 0x10b   :  { %1425 = vmatpush3.bf16.msra.mxu1 %v1557_v1  ;;  %1341 = vmatprep.mubr.msk.f32.mxu1 %vm1558_vm0, %v1559_v5 }
 0x10c   :  { %1187 = vmatmul.mubr.f32.vlgmr.msra.gmra.mrb[0].mxu0 %v1642_v28  ;;  %1426 = vmatprep.subr.bf16.mxu1 %v1556_v0 }
 0x10d   :  { %1377 = vmatpush3.bf16.msra.mxu0 %v1557_v1  ;;  %1221 = vmatprep.mubr.msk.f32.mxu0 %vm1558_vm0, %v1559_v5  ;;  %v970_v5 = vsub.s32 0, %v959_v4 }
 0x10e   :  { %1378 = vmatprep.subr.bf16.mxu0 %v1556_v0 }
 0x10f   :  { %1427 = vmatpush3.bf16.msra.mxu1 %v1557_v1 }
 0x110   :  { %1428 = vmatprep.subr.bf16.mxu1 %v1556_v0 }
 0x111   :  { %1379 = vmatpush3.bf16.msra.mxu0 %v1557_v1 }
 0x112   :  { %1380 = vmatprep.subr.bf16.mxu0 %v1556_v0 }
 0x113   :  { %1429 = vmatpush3.bf16.msra.mxu1 %v1557_v1 }
 0x114   :  { %1430 = vmatprep.subr.bf16.mxu1 %v1556_v0 }
 0x115   :  { %1381 = vmatpush3.bf16.msra.mxu0 %v1557_v1 }
 0x116   :  { %1382 = vmatprep.subr.bf16.mxu0 %v1556_v0 }
 0x117   :  { %1431 = vmatpush3.bf16.msra.mxu1 %v1557_v1 }
 0x118   :  { %1432 = vmatprep.subr.bf16.mxu1 %v1556_v0 }
 0x119   :  { %1383 = vmatpush3.bf16.msra.mxu0 %v1557_v1 }
 0x11a   :  { %1384 = vmatprep.subr.bf16.mxu0 %v1556_v0 }
 0x11b   :  { %1433 = vmatpush3.bf16.msra.mxu1 %v1557_v1 }
 0x11c   :  { %1434 = vmatprep.subr.bf16.mxu1 %v1556_v0 }
 0x11d   :  { %1385 = vmatpush3.bf16.msra.mxu0 %v1557_v1 }
 0x11e   :  { %1386 = vmatprep.subr.bf16.mxu0 %v1556_v0 }
 0x11f   :  { %1435 = vmatpush3.bf16.msra.mxu1 %v1557_v1 }
 0x120   :  { %1436 = vmatprep.subr.bf16.mxu1 %v1556_v0 }
 0x121   :  { %1387 = vmatpush3.bf16.msra.mxu0 %v1557_v1 }
 0x122   :  { %1388 = vmatprep.subr.bf16.mxu0 %v1556_v0 }
 0x123   :  { %1437 = vmatpush3.bf16.msra.mxu1 %v1557_v1 }
 0x124   :  { %1438 = vmatprep.subr.bf16.mxu1 %v1556_v0 }
 0x125   :  { %1389 = vmatpush3.bf16.msra.mxu0 %v1557_v1 }
 0x126   :  { %1390 = vmatprep.subr.bf16.mxu0 %v1556_v0 }
 0x127   :  { %1439 = vmatpush3.bf16.msra.mxu1 %v1557_v1 }
 0x129   :  { %1391 = vmatpush3.bf16.msra.mxu0 %v1557_v1 }
 0x12a   :  { %1342 = vmatmul.mubr.f32.vlgmr.msra.gmra.mrb[0].mxu1 %v1639_v25 }
 0x12c   :  { %1222 = vmatmul.mubr.f32.vlgmr.msra.gmra.mrb[0].mxu0 %v1642_v28 }
 0x16b   :  { %v949_v6 = vpop.xlane.xlu0 %948 }
 0x16c   :  { %v971_v7 = vrot.slane %v949_v6, %v970_v5 }
 0x1fd   :  { %v940_v54 = vpop.f32.mrb[0].mxu1 }
 0x1fe   :  { %1480 = vrcp.f32 %v940_v54  ;;  %v1343_v55 = vpop.f32.mrb[1].mxu1 }
 0x1ff   :  { %v507_v56 = vpop.f32.mrb[0].mxu0 }
 0x200   :  { %v1223_v57 = vpop.f32.mrb[1].mxu0 }
 0x208   :  { %v1481_v58 = vpop.eup %1480 }
 0x209   :  { %v945_v59 = vmul.f32 %v1481_v58, %v507_v56 }
 0x20b   :  { %v951_v60 = vsel %vm950_vm4, %v945_v59, 0.0 }
 0x20c   :  { %v952_v61 = vrot.slane %v951_v60, 4 }
 0x20e   :  { %v953_v62 = vadd.f32 %v952_v61, %v951_v60 }
 0x210   :  { %v954_v63 = vrot.slane %v953_v62, 2 }
 0x212   :  { %v955_v0 = vadd.f32 %v954_v63, %v953_v62 }
 0x214   :  { %v956_v1 = vrot.slane %v955_v0, 1 }
 0x216   :  { %v957_v2 = vadd.f32 %v956_v1, %v955_v0 }
 0x218   :  { %964 = vperm.xlu1 %1468, %v957_v2  }
 0x297   :  { %v965_v8 = vpop.permute.xlu1 %964 }
 0x298   :  { %v967_v9 = vsel %vm961_vm5, %v965_v8, 0.0 }
 0x299   :  { %v972_v10 = vsel %vm960_vm6, %v971_v7, %v967_v9 }
 0x29a   :  { %973 = vst [vmem:[#allocation7] sm:$0xff] %v972_v10 }
 0x29b   :  { %1537 = shalt.err (!%p1534_p6)
}
 0x29c   :  { %s1538_s9 = scalar_lea.hbm %s1759_s2, 128 }
 0x29d   :  { %p1539_p7 = scmp.ne.s32.totalorder %s1759_s2, %s1538_s9  ;;  %p1542_p8 = scmp.lt.u32.totalorder %s1538_s9, %s1759_s2 }
 0x29f   :  { %p1544_p9 = pnand %p1542_p8, %p1539_p7 }
 0x2a1   :  { %1547 = shalt.err (!%p1544_p9)
}
 0x2a2   :  { %983 = dma.vmem_to_hbm [thread:$0]  %s981_s5, 128, %s1759_s2, [#allocation4]  }
 0x2a3   :  { %1552 = dma.done.wait [#allocation4], 128  }
 0x2a4   :  { %1553 = vsyncadd [#allocation4], 4294967168 }
 0x2a5   :  { %987 = vsyncpa [#allocation3], 1 }
 0x2a6   :  { %988 = vsyncpa [#allocation6], 1 }
 0x2a7   :  { %989 = vsyncpa [#allocation4], 1 }

</bundles_post_ra>
